<compile_context>
chip_gen: v6e
topology: v6e:2x2x1
jax: 0.10.0
libtpu: 0.0.40
codegen_flags: <defaults>
</compile_context>

<pallas_src>
import functools

import jax
import jax.numpy as jnp
from jax.experimental import pallas as pl
from jax.experimental.pallas import tpu as pltpu

_VMEM_LIMIT = 32 * 1024 * 1024   # safe on v5e/v6e/v7x; tiles here are far smaller
_NEG = -1e30                     # "minus infinity" for masked softmax lanes


# -----------------------------------------------------------------------------
# Pass 1: 1x1 conv (block-diagonal MXU contraction) + per-tile BN statistics.
# -----------------------------------------------------------------------------
def _conv_stats_kernel(x_ref, w_ref, b_ref, z_ref, stats_ref, *, tn, p, p_pad):
    # x_ref    : (TN*C, P)    activation tile (contiguous NCHW reshape, P on lanes)
    # w_ref    : (TN, TN*C)   constant block-diagonal 1x1-conv weight
    # b_ref    : (1,) f32     SMEM conv bias
    # z_ref    : (TN, P_pad)  f32 conv output tile (lane-dense padded)
    # stats_ref: (1, 8, 128)  f32; row 0 = tile mean, row 1 = tile M2
    z = jnp.dot(w_ref[...], x_ref[...], preferred_element_type=jnp.float32)
    z = z + b_ref[0]                                     # (TN, P) f32

    # Stable per-tile stats (two-pass about the tile mean; tile lives in vregs).
    inv_cnt = 1.0 / float(tn * p)
    tile_mean = jnp.sum(z) * inv_cnt
    d = z - tile_mean
    tile_m2 = jnp.sum(d * d)

    if p_pad != p:
        z = jnp.concatenate(
            [z, jnp.zeros((tn, p_pad - p), dtype=jnp.float32)], axis=-1)
    z_ref[...] = z

    rows = jax.lax.broadcasted_iota(jnp.int32, (8, 128), 0)
    stats_ref[...] = jnp.where(
        rows == 0, tile_mean, jnp.where(rows == 1, tile_m2, 0.0))[None]


# -----------------------------------------------------------------------------
# Pass 2: BN normalize + ReLU + log_softmax over the flattened board (lanes).
# -----------------------------------------------------------------------------
def _norm_logsoftmax_kernel(z_ref, p_ref, out_ref, *, tn, p, p_pad):
    # z_ref  : (TN, P_pad) f32 conv output tile
    # p_ref  : (2,) f32 SMEM [scale, shift]  (scale = gamma*rsqrt(var+eps),
    #                                         shift = beta - mean*scale)
    # out_ref: (TN, P_pad) f32 log-probabilities (pad lanes zeroed)
    scale = p_ref[0]
    shift = p_ref[1]
    a = jnp.maximum(z_ref[...] * scale + shift, 0.0)     # BN + ReLU, f32

    if p_pad != p:
        valid = jax.lax.broadcasted_iota(jnp.int32, (tn, p_pad), 1) < p
        a = jnp.where(valid, a, _NEG)

    m = jnp.max(a, axis=-1, keepdims=True)
    s = a - m
    lse = jnp.log(jnp.sum(jnp.exp(s), axis=-1, keepdims=True))
    lp = s - lse

    if p_pad != p:
        lp = jnp.where(valid, lp, 0.0)
    out_ref[...] = lp


# -----------------------------------------------------------------------------
# Wrapper
# -----------------------------------------------------------------------------
def _pick_tile_n(n, c, itemsize, tile_n=None):
    """Pick an N-tile size satisfying Mosaic's (8,128) block constraints."""
    def _ok(t):
        return t == n or (n % t == 0 and t % 8 == 0 and (t * c) % 8 == 0)

    if tile_n is not None:
        assert _ok(tile_n), f"tile_n={tile_n} violates tiling constraints"
        return tile_n
    # Cap TN so the block-diag trick's zero FLOPs stay hidden under the tile DMA
    # (review guidance: <=128 bf16, <=64 f32) and x tiles stay VMEM-friendly.
    cap = 128 if itemsize <= 2 else 64
    if n <= cap:
        return n
    for t in range(cap, 7, -8):
        if _ok(t):
            return t
    # TODO(synk): pad N to a multiple of 8 instead of one monolithic tile.
    return n


def policy_head(x_nchw, conv_w, conv_b, gamma, beta, eps=1e-5,
                *, compute_dtype=None, tile_n=None):
    """x_nchw: (N, C, H, W) float32/bfloat16 (PyTorch NCHW).
    conv_w: (C,) 1x1-conv weight, conv_b: scalar bias, gamma/beta/eps: BN params.
    compute_dtype: optional dtype (e.g. jnp.bfloat16) for the activation/weight
    DMA and MXU contraction (accumulation and BN/softmax math stay f32).
    Returns (N, H*W) float32 log-probabilities."""
    N, C, H, W = x_nchw.shape
    P = H * W
    P_pad = ((P + 127) // 128) * 128

    dt = jnp.dtype(compute_dtype) if compute_dtype is not None else x_nchw.dtype
    TN = _pick_tile_n(N, C, dt.itemsize, tile_n)
    ntiles = N // TN

    # Contiguous reshape only (no transpose): (N, C, H, W) -> (N*C, H*W).
    x_flat = x_nchw.reshape(N * C, P).astype(dt)

    # Tiny per-tile block-diagonal weight (TN, TN*C), reused by every grid step.
    w_blk = jnp.kron(jnp.eye(TN, dtype=dt),
                     jnp.asarray(conv_w, dtype=dt).reshape(1, C))
    bias = jnp.asarray([conv_b], dtype=jnp.float32)

    # ---- pass 1: conv + per-tile stats (parallel grid over N-tiles) ----
    kern1 = functools.partial(_conv_stats_kernel, tn=TN, p=P, p_pad=P_pad)
    z_pad, tile_stats = pl.pallas_call(
        kern1,
        grid=(ntiles,),
        out_shape=(jax.ShapeDtypeStruct((N, P_pad), jnp.float32),
                   jax.ShapeDtypeStruct((ntiles, 8, 128), jnp.float32)),
        in_specs=[
            pl.BlockSpec((TN * C, P), lambda i: (i, 0)),
            pl.BlockSpec((TN, TN * C), lambda i: (0, 0)),
            pl.BlockSpec(memory_space=pltpu.MemorySpace.SMEM),
        ],
        out_specs=(
            pl.BlockSpec((TN, P_pad), lambda i: (i, 0)),
            pl.BlockSpec((1, 8, 128), lambda i: (i, 0, 0)),
        ),
        compiler_params=pltpu.CompilerParams(
            dimension_semantics=("parallel",),
            vmem_limit_bytes=_VMEM_LIMIT),
    )(x_flat, w_blk, bias)

    # ---- tiny cross-tile combine (Chan's grouped-variance, equal counts) ----
    tile_mean = tile_stats[:, 0, 0]
    tile_m2 = tile_stats[:, 1, 0]
    mean = jnp.mean(tile_mean)
    m2 = jnp.sum(tile_m2) + float(TN * P) * jnp.sum(jnp.square(tile_mean - mean))
    var = m2 / float(N * P)                     # biased variance (BN training fwd)
    scale = gamma * jax.lax.rsqrt(var + eps)
    shift = beta - mean * scale
    params = jnp.stack([scale, shift]).astype(jnp.float32)

    # ---- pass 2: normalize + ReLU + log_softmax (parallel grid over N-tiles) ----
    kern2 = functools.partial(_norm_logsoftmax_kernel, tn=TN, p=P, p_pad=P_pad)
    out = pl.pallas_call(
        kern2,
        grid=(ntiles,),
        out_shape=jax.ShapeDtypeStruct((N, P_pad), jnp.float32),
        in_specs=[
            pl.BlockSpec((TN, P_pad), lambda i: (i, 0)),
            pl.BlockSpec(memory_space=pltpu.MemorySpace.SMEM),
        ],
        out_specs=pl.BlockSpec((TN, P_pad), lambda i: (i, 0)),
        compiler_params=pltpu.CompilerParams(
            dimension_semantics=("parallel",),
            vmem_limit_bytes=_VMEM_LIMIT),
    )(z_pad, params)

    return out[:, :P] if P_pad != P else out


def policy_head_ref(x_nchw, conv_w, conv_b, gamma, beta, eps=1e-5):
    """Pure-JAX reference matching the PyTorch forward (training-mode BN)."""
    z = jnp.einsum("nchw,c->nhw",
                   x_nchw.astype(jnp.float32),
                   jnp.asarray(conv_w, jnp.float32)) + conv_b
    mean = jnp.mean(z)
    var = jnp.mean(jnp.square(z - mean))
    z = (z - mean) / jnp.sqrt(var + eps) * gamma + beta
    z = jnp.maximum(z, 0.0)
    z = z.reshape(z.shape[0], -1)
    return jax.nn.log_softmax(z, axis=1)


if __name__ == "__main__":
    key = jax.random.PRNGKey(0)
    kx, kw, kx2 = jax.random.split(key, 3)

    # Shapes consistent with PolicyHead(in_channels, board_len): C=32, board 8x8.
    C, B = 32, 8
    conv_w = jax.random.normal(kw, (C,), dtype=jnp.float32) / jnp.sqrt(C)
    conv_b = 0.1
    gamma, beta, eps = 1.2, 0.1, 1e-5

    # Case 1: tiny batch (grid of 1), f32 path, tight tolerance.
    x1 = jax.random.normal(kx, (2, C, B, B), dtype=jnp.float32)
    out1 = jax.block_until_ready(policy_head(x1, conv_w, conv_b, gamma, beta, eps))
    ref1 = policy_head_ref(x1, conv_w, conv_b, gamma, beta, eps)
    assert out1.shape == (2, B * B)
    assert jnp.allclose(out1, ref1, atol=1e-4, rtol=1e-4), (
        f"f32 single-tile max err {jnp.max(jnp.abs(out1 - ref1))}")

    # Case 2: multi-tile grid (N=16, TN=8 -> 2 pipelined tiles) exercising the
    # per-tile stats + cross-tile BN combine.
    x2 = jax.random.normal(kx2, (16, C, B, B), dtype=jnp.float32)
    out2 = jax.block_until_ready(
        policy_head(x2, conv_w, conv_b, gamma, beta, eps, tile_n=8))
    ref2 = policy_head_ref(x2, conv_w, conv_b, gamma, beta, eps)
    assert jnp.allclose(out2, ref2, atol=1e-4, rtol=1e-4), (
        f"f32 multi-tile max err {jnp.max(jnp.abs(out2 - ref2))}")

    # Case 3: bf16 activation/weight DMA + MXU path (loose tolerance vs f32 ref).
    out3 = jax.block_until_ready(
        policy_head(x1, conv_w, conv_b, gamma, beta, eps,
                    compute_dtype=jnp.bfloat16))
    assert jnp.allclose(out3, ref1, atol=1e-1, rtol=1e-1), (
        f"bf16 path max err {jnp.max(jnp.abs(out3 - ref1))}")

    print("KERNEL_OK")
</pallas_src>

<mosaic_0001>
module attributes {stable_mosaic.version = 11 : i64} {
  func.func @_conv_stats_kernel(%arg0: i32, %arg1: memref<64x64xf32, #tpu.memory_space<vmem>>, %arg2: memref<2x64xf32, #tpu.memory_space<vmem>>, %arg3: memref<1xf32, #tpu.memory_space<smem>>, %arg4: memref<2x128xf32, #tpu.memory_space<vmem>>, %arg5: memref<1x8x128xf32, #tpu.memory_space<vmem>>) attributes {dimension_semantics = [#tpu.dimension_semantics<parallel>], iteration_bounds = array<i64: 1>, scalar_prefetch = 0 : i64, scratch_operands = 0 : i64, tpu.core_type = #tpu.core_type<tc>, window_params = [{transform_indices = @transform_0, window_bounds = array<i64: 64, 64>}, {pipeline_mode = #tpu.pipeline_mode<synchronous>, transform_indices = @transform_1, window_bounds = array<i64: 2, 64>}, {transform_indices = @transform_2, window_bounds = array<i64: 1>}, {transform_indices = @transform_3, window_bounds = array<i64: 2, 128>}, {transform_indices = @transform_4, window_bounds = array<i64: 1, 8, 128>}]} {
    %c0 = arith.constant 0 : index
    %c0_0 = arith.constant 0 : index
    %0 = vector.load %arg2[%c0, %c0_0] : memref<2x64xf32, #tpu.memory_space<vmem>>, vector<2x64xf32>
    %c0_1 = arith.constant 0 : index
    %c0_2 = arith.constant 0 : index
    %1 = vector.load %arg1[%c0_1, %c0_2] : memref<64x64xf32, #tpu.memory_space<vmem>>, vector<64x64xf32>
    %cst = arith.constant dense<0.000000e+00> : vector<2x64xf32>
    %2 = tpu.matmul %0, %1, %cst {dimension_numbers = #tpu.dot_dimension_numbers<[1], [0], [0], [1], [0, 0, 1, 1], [], []>} : vector<2x64xf32>, vector<64x64xf32>, vector<2x64xf32> -> vector<2x64xf32>
    %c0_3 = arith.constant 0 : index
    %3 = memref.load %arg3[%c0_3] : memref<1xf32, #tpu.memory_space<smem>>
    %4 = vector.broadcast %3 : f32 to vector<2x64xf32>
    %5 = arith.addf %2, %4 : vector<2x64xf32>
    %6 = vector.shape_cast %5 : vector<2x64xf32> to vector<1x2x64xf32>
    %cst_4 = arith.constant dense<0.000000e+00> : vector<1xf32>
    %7 = vector.multi_reduction <add>, %6, %cst_4 [1, 2] : vector<1x2x64xf32> to vector<1xf32>
    %8 = vector.shape_cast %7 : vector<1xf32> to vector<1x1x1xf32>
    %9 = vector.extract %8[0, 0, 0] : f32 from vector<1x1x1xf32>
    %cst_5 = arith.constant 7.812500e-03 : f32
    %10 = arith.mulf %9, %cst_5 : f32
    %11 = vector.broadcast %10 : f32 to vector<2x64xf32>
    %12 = arith.subf %5, %11 : vector<2x64xf32>
    %13 = arith.mulf %12, %12 : vector<2x64xf32>
    %14 = vector.shape_cast %13 : vector<2x64xf32> to vector<1x2x64xf32>
    %cst_6 = arith.constant dense<0.000000e+00> : vector<1xf32>
    %15 = vector.multi_reduction <add>, %14, %cst_6 [1, 2] : vector<1x2x64xf32> to vector<1xf32>
    %16 = vector.shape_cast %15 : vector<1xf32> to vector<1x1x1xf32>
    %17 = vector.extract %16[0, 0, 0] : f32 from vector<1x1x1xf32>
    %cst_7 = arith.constant 0.000000e+00 : f32
    %18 = vector.broadcast %cst_7 : f32 to vector<2x64xf32>
    %19 = tpu.concatenate %5, %18 in 1 : vector<2x64xf32>, vector<2x64xf32> -> vector<2x128xf32>
    %c0_8 = arith.constant 0 : index
    %c0_9 = arith.constant 0 : index
    %20 = vector.load %arg4[%c0_8, %c0_9] : memref<2x128xf32, #tpu.memory_space<vmem>>, vector<2x128xf32>
    tpu.vector_store %arg4[%c0_8, %c0_9], %19 {strides = array<i32>} : memref<2x128xf32, #tpu.memory_space<vmem>>, vector<2x128xf32>,
    %21 = tpu.iota {dimensions = array<i32: 0>} : vector<8x128xi32>
    %c0_i32 = arith.constant 0 : i32
    %22 = vector.broadcast %c0_i32 : i32 to vector<8x128xi32>
    %23 = arith.cmpi eq, %21, %22 : vector<8x128xi32>
    %c1_i32 = arith.constant 1 : i32
    %24 = vector.broadcast %c1_i32 : i32 to vector<8x128xi32>
    %25 = arith.cmpi eq, %21, %24 : vector<8x128xi32>
    %cst_10 = arith.constant 0.000000e+00 : f32
    %26 = vector.broadcast %17 : f32 to vector<8x128xf32>
    %27 = vector.broadcast %cst_10 : f32 to vector<8x128xf32>
    %28 = arith.select %25, %26, %27 : vector<8x128xi1>, vector<8x128xf32>
    %29 = vector.broadcast %10 : f32 to vector<8x128xf32>
    %30 = arith.select %23, %29, %28 : vector<8x128xi1>, vector<8x128xf32>
    %31 = vector.shape_cast %30 : vector<8x128xf32> to vector<1x8x128xf32>
    %c0_11 = arith.constant 0 : index
    %c0_12 = arith.constant 0 : index
    %c0_13 = arith.constant 0 : index
    %32 = vector.load %arg5[%c0_11, %c0_12, %c0_13] : memref<1x8x128xf32, #tpu.memory_space<vmem>>, vector<1x8x128xf32>
    tpu.vector_store %arg5[%c0_11, %c0_12, %c0_13], %31 {strides = array<i32>} : memref<1x8x128xf32, #tpu.memory_space<vmem>>, vector<1x8x128xf32>,
    return
  }
  func.func @transform_0(%arg0: i32) -> (i32, i32) {
    %c0_i32 = arith.constant 0 : i32
    %c0_i32_0 = arith.constant 0 : i32
    return %arg0, %c0_i32 : i32, i32
  }
  func.func @transform_1(%arg0: i32) -> (i32, i32) {
    %c0_i32 = arith.constant 0 : i32
    %c0_i32_0 = arith.constant 0 : i32
    %c0_i32_1 = arith.constant 0 : i32
    return %c0_i32, %c0_i32_0 : i32, i32
  }
  func.func @transform_2(%arg0: i32) -> i32 {
    %c0_i32 = arith.constant 0 : i32
    %c0_i32_0 = arith.constant 0 : i32
    return %c0_i32 : i32
  }
  func.func @transform_3(%arg0: i32) -> (i32, i32) {
    %c0_i32 = arith.constant 0 : i32
    %c0_i32_0 = arith.constant 0 : i32
    return %arg0, %c0_i32 : i32, i32
  }
  func.func @transform_4(%arg0: i32) -> (i32, i32, i32) {
    %c0_i32 = arith.constant 0 : i32
    %c0_i32_0 = arith.constant 0 : i32
    %c0_i32_1 = arith.constant 0 : i32
    return %arg0, %c0_i32, %c0_i32_0 : i32, i32, i32
  }
}

</mosaic_0001>

<bundles_post_ra>
// kernel: tpu_custom_call.1
= control target key start
LH: loop header
LB: loop body
LE: loop exit
PB: predicated region body
PF: predicated region fallthrough
CT: control target
= control target key end

     0   :  { %11 = vsyncpa [#allocation4], 0  ;;  %s337_s0 = inlined_call_operand.hbm [shape: f32[64,64], index: 0, kind: input, shape index: {}]   ;;  %s338_s1 = inlined_call_operand.vmem [shape: f32[2,64], index: 1, kind: input, shape index: {}]   ;;  %s339_s2 = inlined_call_operand.<no memory space> [shape: f32[1], index: 2, kind: input, shape index: {}]   ;;  %s340_s3 = inlined_call_operand.hbm [shape: f32[2,128], index: 3, kind: output, shape index: {0}]   ;;  %s341_s4 = inlined_call_operand.hbm [shape: f32[1,8,128], index: 4, kind: output, shape index: {1}]  }
   0x1   :  { %12 = vsyncpa [#allocation5], 0 }
   0x2   :  { %13 = vsyncpa [#allocation8], 0  ;;  %s288_s15 = smov [#allocation3]  }
   0x3   :  { %s19_s16 = sshll.u32 %s288_s15, 4  ;;  %s20_s16 = int_to_ptr.vmem [resolvable:$true] %s19_s16 }
   0x4   :  { %s230_s17 = scalar_lea.vmem %s20_s16, 1024  ;;  %p235_p1 = scmp.lt.s32.totalorder %s20_s16, %s20_s16 }
   0x5   :  { %p231_p0 = scmp.ne.s32.totalorder %s20_s16, %s230_s17  ;;  %p236_p2 = scmp.lt.s32.totalorder %s230_s17, %s230_s17 }
   0x7   :  { %p237_p3 = por %p236_p2, %p235_p1 }
   0x9   :  { %p238_p4 = pnand %p237_p3, %p231_p0 }
   0xb   :  { %241 = shalt.err (!%p238_p4)
}
   0xc   :  { %s289_s18 = smov 128   ;;  %s290_s19 = smov 8  }
   0xd   :  { %25 = dma.hbm_to_vmem [thread:$0]  %s337_s0, 1024, %s20_s16, [#allocation4], %s289_s18, %s289_s18, %s290_s19  }
   0xe   :  { %282 = dma.done.wait [#allocation4], 1024  }
   0xf   :  { %283 = vsyncadd [#allocation4], 4294966272  ;;  %v291_v0 = vmov 0.0   ;;  %vm292_vm0 = vmmov 0   ;;  %v41_v1 = vld [vmem:[#allocation3 + $0x38] sm:$0xff]  ;;  %v40_v2 = vld [vmem:[#allocation3 + $0x30] sm:$0xff]  ;;  %v43_v10 = vstv %s339_s2 }
  0x10   :  { %192 = vmatprep.subr.mxu0 %v291_v0  ;;  %208 = vmatprep.mubr.msk.f32.mxu0 %vm292_vm0, %v291_v0  ;;  %v39_v3 = vld [vmem:[#allocation3 + $0x28] sm:$0xff]  ;;  %v38_v4 = vld [vmem:[#allocation3 + $0x20] sm:$0xff]  ;;  %v37_v5 = vld [vmem:[#allocation3 + $0x18] sm:$0xff]  ;;  %vm44_vm1 = vcmask 523264   ;;  %vm118_vm2 = vcmask 517120   ;;  %s293_s2 = smov [#allocation6]  }
  0x11   :  { %193 = vmatpush3.msra.mxu0 %v41_v1  ;;  %v36_v6 = vld [vmem:[#allocation3 + $0x10] sm:$0xff]  ;;  %v35_v7 = vld [vmem:[#allocation3 + $0x8] sm:$0xff]  ;;  %v34_v8 = vld [vmem:[#allocation3] sm:$0xff]  ;;  %s159_s26 = sshll.u32 %s293_s2, 4  ;;  %s160_s26 = int_to_ptr.vmem [resolvable:$true] %s159_s26 }
  0x12   :  { %194 = vmatprep.subr.mxu0 %v291_v0  ;;  %v33_v9 = vld [vmem:[%s338_s1] sm:$0x3]  ;;  %s242_s27 = scalar_lea.vmem %s160_s26, 32  ;;  %p247_p6 = scmp.lt.s32.totalorder %s160_s26, %s160_s26 }
  0x13   :  { %195 = vmatpush3.msra.mxu0 %v40_v2  ;;  %p243_p5 = scmp.ne.s32.totalorder %s160_s26, %s242_s27  ;;  %p248_p7 = scmp.lt.s32.totalorder %s242_s27, %s242_s27 }
  0x14   :  { %196 = vmatprep.subr.mxu0 %v291_v0 }
  0x15   :  { %197 = vmatpush3.msra.mxu0 %v39_v3  ;;  %p249_p8 = por %p248_p7, %p247_p6 }
  0x16   :  { %198 = vmatprep.subr.mxu0 %v291_v0 }
  0x17   :  { %199 = vmatpush3.msra.mxu0 %v38_v4  ;;  %p250_p9 = pnand %p249_p8, %p243_p5 }
  0x18   :  { %200 = vmatprep.subr.mxu0 %v291_v0 }
  0x19   :  { %201 = vmatpush3.msra.mxu0 %v37_v5 }
  0x1a   :  { %202 = vmatprep.subr.mxu0 %v291_v0 }
  0x1b   :  { %203 = vmatpush3.msra.mxu0 %v36_v6 }
  0x1c   :  { %204 = vmatprep.subr.mxu0 %v291_v0 }
  0x1d   :  { %205 = vmatpush3.msra.mxu0 %v35_v7 }
  0x1e   :  { %206 = vmatprep.subr.mxu0 %v291_v0 }
  0x1f   :  { %207 = vmatpush3.msra.mxu0 %v34_v8 }
  0x20   :  { %209 = vmatmul.mubr.msk.f32.vlgmr.msra.gmra.mxu0 %vm44_vm1, %v33_v9 }
  0xe0   :  { %v114_v11 = vpop.f32.mrf.mxu0 }
  0xe1   :  { %v115_v12 = vadd.f32 %v114_v11, %v43_v10 }
  0xe2   :  { %v210_v13 = vpop.f32.mrf.mxu0 }
  0xe3   :  { %v119_v14 = vsel %vm118_vm2, %v115_v12, 0.0  ;;  %v143_v15 = vsel %vm44_vm1, %v115_v12, 0.0 }
  0xe4   :  { %120 = vadd.xlane.f32.xlu0 %v119_v14  ;;  %144 = vst [vmem:[#allocation6] sm:$0x3] %v143_v15 }
 0x16d   :  { %v121_v16 = vpop.xlane.xlu0 %120 }
 0x16e   :  { %v122_v17 = vrot.slane %v121_v16, 4 }
 0x170   :  { %v123_v18 = vadd.f32 %v122_v17, %v121_v16 }
 0x172   :  { %v124_v19 = vrot.slane %v123_v18, 2 }
 0x174   :  { %v125_v20 = vadd.f32 %v124_v19, %v123_v18 }
 0x176   :  { %v126_v21 = vrot.slane %v125_v20, 1 }
 0x178   :  { %v127_v22 = vadd.f32 %v126_v21, %v125_v20 }
 0x17a   :  { %211 = vpush %v127_v22 }
 0x1ab   :  { %s212_s1 = spop %211 }
 0x1ac   :  { %s129_s25 = smul.f32 0.0078125, %s212_s1 }
 0x1ae   :  { %v130_v23 = vstv %s129_s25 }
 0x1af   :  { %v131_v24 = vsub.f32 %v115_v12, %v130_v23 }
 0x1b1   :  { %v132_v25 = vmul.f32 %v131_v24, %v131_v24 }
 0x1b3   :  { %v133_v26 = vsel %vm118_vm2, %v132_v25, 0.0 }
 0x1b4   :  { %134 = vadd.xlane.f32.xlu0 %v133_v26 }
 0x1b5   :  { %253 = shalt.err (!%p250_p9)
}
 0x1b6   :  { %162 = dma.vmem_to_hbm [thread:$0]  %s160_s26, 32, %s340_s3, [#allocation5]   ;;  %v145_v34 = vlaneseq }
 0x1b7   :  { %s294_s30 = smov [#allocation7]  }
 0x1b8   :  { %v146_v35 = vshrl.u32 %v145_v34, 7  ;;  %s169_s5 = sshll.u32 %s294_s30, 4  ;;  %s170_s5 = int_to_ptr.vmem [resolvable:$true] %s169_s5 }
 0x1b9   :  { %s262_s3 = scalar_lea.vmem %s170_s5, 128  ;;  %p267_p11 = scmp.lt.s32.totalorder %s170_s5, %s170_s5 }
 0x1ba   :  { %vm148_vm3 = vcmp.eq.s32.totalorder %v146_v35, 1  ;;  %vm147_vm4 = vcmp.eq.s32.totalorder %v146_v35, 0  ;;  %p263_p10 = scmp.ne.s32.totalorder %s170_s5, %s262_s3  ;;  %p268_p12 = scmp.lt.s32.totalorder %s262_s3, %s262_s3 }
 0x1bc   :  { %p269_p13 = por %p268_p12, %p267_p11 }
 0x1be   :  { %p270_p0 = pnand %p269_p13, %p263_p10 }
 0x23d   :  { %v135_v27 = vpop.xlane.xlu0 %134 }
 0x23e   :  { %v136_v28 = vrot.slane %v135_v27, 4 }
 0x240   :  { %v137_v29 = vadd.f32 %v136_v28, %v135_v27 }
 0x242   :  { %v138_v30 = vrot.slane %v137_v29, 2 }
 0x244   :  { %v139_v31 = vadd.f32 %v138_v30, %v137_v29 }
 0x246   :  { %v140_v32 = vrot.slane %v139_v31, 1 }
 0x248   :  { %v141_v33 = vadd.f32 %v140_v32, %v139_v31 }
 0x24a   :  { %213 = vpush %v141_v33 }
 0x27b   :  { %s214_s6 = spop %213 }
 0x27c   :  { %v149_v36 = vstv %s214_s6 }
 0x27d   :  { %v150_v37 = vsel %vm148_vm3, %v149_v36, 0.0 }
 0x27e   :  { %v151_v38 = vsel %vm147_vm4, %v130_v23, %v150_v37 }
 0x27f   :  { %152 = vst [vmem:[#allocation7] sm:$0xff] %v151_v38 }
 0x280   :  { %273 = shalt.err (!%p270_p0)
}
 0x281   :  { %172 = dma.vmem_to_hbm [thread:$0]  %s170_s5, 128, %s341_s4, [#allocation8]  }
 0x282   :  { %284 = dma.done.wait [#allocation5], 32  }
 0x283   :  { %285 = vsyncadd [#allocation5], 4294967264 }
 0x284   :  { %286 = dma.done.wait [#allocation8], 128  }
 0x285   :  { %287 = vsyncadd [#allocation8], 4294967168 }
 0x286   :  { %179 = vsyncpa [#allocation4], 1 }
 0x287   :  { %180 = vsyncpa [#allocation5], 1 }
 0x288   :  { %181 = vsyncpa [#allocation8], 1 }

</bundles_post_ra>
